<compile_context>
chip_gen: v7x
topology: tpu7x:2x2x1
jax: 0.10.0
libtpu: 0.0.40
codegen_flags: <defaults>
</compile_context>

<pallas_src>
import numpy as np
import jax
import jax.numpy as jnp
from jax.experimental import pallas as pl
from jax.experimental.pallas import tpu as pltpu

H1 = 400      # fc1 true width
H2 = 300      # fc2 true width
H1P = 512     # fc1 padded width (multiple of 128)
H2P = 384     # fc2 padded width (multiple of 128) -- do NOT pad to 512


def _round_up(x, m):
    return ((x + m - 1) // m) * m


def critic_kernel(inp_ref, w1_ref, b1_ref, w2_ref, b2_ref, w3_ref, b3_ref,
                  q_ref):
    # Fused fc1 + action pass-through (bf16 operands, f32 accumulation).
    #   lanes [0, 400)     : fc1(state), ReLU applied
    #   lanes [400, 400+A) : action, routed via identity rows, zero bias, no ReLU
    #   lanes [400+A, 512) : exact zeros
    x_in = inp_ref[...].astype(jnp.bfloat16)
    z1 = jnp.dot(x_in, w1_ref[...],
                 preferred_element_type=jnp.float32) + b1_ref[...]
    # Lane mask applies ReLU only to the true fc1 lanes.  (Cheap VPU filler
    # under the MXU shadow; hoist to a resident mask only if VALU saturates.)
    col = jax.lax.broadcasted_iota(jnp.int32, z1.shape, 1)
    x_cat = jnp.where(col < H1, jnp.maximum(z1, 0.0), z1)

    # fc2 over the 512-wide concatenated/padded activation (single bf16 GEMM).
    z2 = jnp.dot(x_cat.astype(jnp.bfloat16), w2_ref[...],
                 preferred_element_type=jnp.float32) + b2_ref[...]
    x2 = jnp.maximum(z2, 0.0)

    # fc3 (300 -> 1) as a VPU multiply + lane reduction (f32; keeps MXU free).
    q_ref[...] = jnp.sum(x2 * w3_ref[...], axis=-1, keepdims=True) + b3_ref[...]


def _resident_spec(shape):
    """BlockSpec for a resident operand (constant index_map).

    Single-buffered where supported -- the block never changes, so there is
    nothing to pipeline and no need to reserve a second VMEM buffer.
    """
    index_map = lambda i: (0,) * len(shape)
    if hasattr(pl, "Buffered"):
        try:
            return pl.BlockSpec(shape, index_map, pipeline_mode=pl.Buffered(1))
        except TypeError:  # older JAX without pipeline_mode on BlockSpec
            pass
    return pl.BlockSpec(shape, index_map)


def _choose_batch_tile(B, block_b):
    """Pick the batch tile.

    Rows are rounded to the 8-row sublane.  For B > 8 the tile is capped at
    ceil(B/2) so there are always >= 2 balanced tiles: the grid axis is
    'parallel', so on v7x both TensorCores get work even for medium batches.
    """
    if B <= 8:
        return _round_up(max(B, 1), 8)
    half = _round_up((B + 1) // 2, 8)
    return max(8, min(block_b, half))


def critic_forward(state, action, kernel_params, *, block_b=512):
    """Pallas forward.  block_b: max batch tile (512 is a good default on
    v5e/v6e/v7x; M is streamed through the MXU so bigger only helps)."""
    B, S = state.shape
    A = action.shape[1]
    SA = S + A

    # Concatenate state|action once on the XLA side (tiny op).  Kept f32 so
    # the row tile only needs 8-row sublane alignment; the bf16 cast for the
    # MXU happens inside the kernel.
    inp = jnp.concatenate([state, action], axis=1).astype(jnp.float32)

    TB = _choose_batch_tile(B, block_b)
    B_pad = _round_up(B, TB)
    if B_pad != B:
        inp = jnp.pad(inp, ((0, B_pad - B), (0, 0)))
    num_tiles = B_pad // TB

    w1, b1, w2, b2, w3, b3 = kernel_params

    q_pad = pl.pallas_call(
        critic_kernel,
        out_shape=jax.ShapeDtypeStruct((B_pad, 1), jnp.float32),
        grid=(num_tiles,),
        in_specs=[
            pl.BlockSpec((TB, SA), lambda i: (i, 0)),   # row tile (pipelined)
            _resident_spec(w1.shape),                   # weights: resident,
            _resident_spec(b1.shape),                   # single-buffered
            _resident_spec(w2.shape),
            _resident_spec(b2.shape),
            _resident_spec(w3.shape),
            _resident_spec(b3.shape),
        ],
        # TODO(synk): at very large batch (thousands of tiles) switch to a
        # lane-dense (num_tiles, TB) output slab + wrapper reshape to drop the
        # masked (TB, 1) store epilogue; negligible at these sizes.
        out_specs=pl.BlockSpec((TB, 1), lambda i: (i, 0)),
        compiler_params=pltpu.CompilerParams(
            dimension_semantics=("parallel",)),
    )(inp, w1, b1, w2, b2, w3, b3)

    return q_pad[:B]


def init_critic_params(key, nb_states, nb_actions):
    """Deterministic init mirroring Critic.__init__/init_weights.

    Returns raw PyTorch-layout params (weight = (out, in), bias = (out,)).
    fanin_init in the reference uses size[0] (== out_features) as fanin,
    which is reproduced here.
    """
    k1, k2, k3, kb1, kb2, kb3 = jax.random.split(key, 6)

    v1 = 1.0 / np.sqrt(H1)                 # fanin_init(fc1.weight): size[0]=400
    W1 = jax.random.uniform(k1, (H1, nb_states), jnp.float32, -v1, v1)
    v2 = 1.0 / np.sqrt(H2)                 # fanin_init(fc2.weight): size[0]=300
    W2 = jax.random.uniform(k2, (H2, H1 + nb_actions), jnp.float32, -v2, v2)
    init_w = 0.003
    W3 = jax.random.uniform(k3, (1, H2), jnp.float32, -init_w, init_w)

    # default nn.Linear bias init: U(-1/sqrt(in_features), 1/sqrt(in_features))
    bb1 = 1.0 / np.sqrt(nb_states)
    bb2 = 1.0 / np.sqrt(H1 + nb_actions)
    bb3 = 1.0 / np.sqrt(H2)
    b1 = jax.random.uniform(kb1, (H1,), jnp.float32, -bb1, bb1)
    b2 = jax.random.uniform(kb2, (H2,), jnp.float32, -bb2, bb2)
    b3 = jax.random.uniform(kb3, (1,), jnp.float32, -bb3, bb3)
    return (W1, b1, W2, b2, W3, b3)


def pack_kernel_params(raw, nb_states, nb_actions):
    """One-time host-side repack: transpose, zero-pad to lane multiples, fold
    the action pass-through (identity rows) into the fc1 weight, and store the
    two GEMM operands in bf16 (f32 accumulation happens in the kernel)."""
    W1, b1, W2, b2, W3, b3 = raw
    S, A = nb_states, nb_actions

    w1_aug = jnp.zeros((S + A, H1P), jnp.float32)
    w1_aug = w1_aug.at[:S, :H1].set(W1.T)                          # fc1 weights
    w1_aug = w1_aug.at[S:, H1:H1 + A].set(jnp.eye(A, dtype=jnp.float32))
    b1_pad = jnp.zeros((1, H1P), jnp.float32).at[0, :H1].set(b1)

    w2_pad = jnp.zeros((H1P, H2P), jnp.float32)
    w2_pad = w2_pad.at[:H1, :H2].set(W2[:, :H1].T)                 # x part
    w2_pad = w2_pad.at[H1:H1 + A, :H2].set(W2[:, H1:].T)           # action part
    b2_pad = jnp.zeros((1, H2P), jnp.float32).at[0, :H2].set(b2)

    w3_row = jnp.zeros((1, H2P), jnp.float32).at[0, :H2].set(W3[0])
    b3_ = b3.reshape(1, 1)

    # GEMM operands -> bf16; biases and the fc3 row stay f32.
    return (w1_aug.astype(jnp.bfloat16), b1_pad,
            w2_pad.astype(jnp.bfloat16), b2_pad,
            w3_row, b3_)


def critic_ref(state, action, raw):
    """Pure-JAX f32 reference mirroring the PyTorch forward exactly."""
    W1, b1, W2, b2, W3, b3 = raw
    x = jnp.maximum(state @ W1.T + b1, 0.0)
    cat = jnp.concatenate([x, action], axis=1)
    x = jnp.maximum(cat @ W2.T + b2, 0.0)
    return x @ W3.T + b3


if __name__ == "__main__":
    nb_states, nb_actions = 16, 4

    key = jax.random.PRNGKey(0)
    kp, ks, ka, ks2, ka2 = jax.random.split(key, 5)
    raw = init_critic_params(kp, nb_states, nb_actions)
    kparams = pack_kernel_params(raw, nb_states, nb_actions)

    # bf16 GEMM operands => bf16-level parity with the f32 reference.
    RTOL, ATOL = 5e-2, 2e-3

    # Small-batch check (B=2, single tile).
    B = 2
    state = jax.random.normal(ks, (B, nb_states), jnp.float32)
    action = jax.random.normal(ka, (B, nb_actions), jnp.float32)
    q = jax.block_until_ready(critic_forward(state, action, kparams))
    q_ref = critic_ref(state, action, raw)
    np.testing.assert_allclose(np.asarray(q), np.asarray(q_ref),
                               rtol=RTOL, atol=ATOL)
    assert q.shape == (B, 1)

    # Larger, non-divisible batch: exercises padding and the >=2-tile rule
    # (B=300 -> TB=152, two balanced "parallel" tiles).
    B2 = 300
    state2 = jax.random.normal(ks2, (B2, nb_states), jnp.float32)
    action2 = jax.random.normal(ka2, (B2, nb_actions), jnp.float32)
    q2 = jax.block_until_ready(critic_forward(state2, action2, kparams))
    q2_ref = critic_ref(state2, action2, raw)
    np.testing.assert_allclose(np.asarray(q2), np.asarray(q2_ref),
                               rtol=RTOL, atol=ATOL)
    assert q2.shape == (B2, 1)

    # Same batch with a smaller tile cap (3 tiles) to exercise the grid loop.
    q3 = jax.block_until_ready(
        critic_forward(state2, action2, kparams, block_b=128))
    np.testing.assert_allclose(np.asarray(q3), np.asarray(q2_ref),
                               rtol=RTOL, atol=ATOL)

    print("KERNEL_OK")
</pallas_src>

<mosaic_0001>
module attributes {stable_mosaic.version = 11 : i64} {
  func.func @critic_kernel(%arg0: i32, %arg1: memref<8x20xf32, #tpu.memory_space<vmem>>, %arg2: memref<20x512xbf16, #tpu.memory_space<vmem>>, %arg3: memref<1x512xf32, #tpu.memory_space<vmem>>, %arg4: memref<512x384xbf16, #tpu.memory_space<vmem>>, %arg5: memref<1x384xf32, #tpu.memory_space<vmem>>, %arg6: memref<1x384xf32, #tpu.memory_space<vmem>>, %arg7: memref<1x1xf32, #tpu.memory_space<vmem>>, %arg8: memref<8x1xf32, #tpu.memory_space<vmem>>) attributes {dimension_semantics = [#tpu.dimension_semantics<parallel>], iteration_bounds = array<i64: 1>, scalar_prefetch = 0 : i64, scratch_operands = 0 : i64, tpu.core_type = #tpu.core_type<tc>, window_params = [{transform_indices = @transform_0, window_bounds = array<i64: 8, 20>}, {pipeline_mode = #tpu.pipeline_mode<synchronous>, transform_indices = @transform_1, window_bounds = array<i64: 20, 512>}, {pipeline_mode = #tpu.pipeline_mode<synchronous>, transform_indices = @transform_2, window_bounds = array<i64: 1, 512>}, {pipeline_mode = #tpu.pipeline_mode<synchronous>, transform_indices = @transform_3, window_bounds = array<i64: 512, 384>}, {pipeline_mode = #tpu.pipeline_mode<synchronous>, transform_indices = @transform_4, window_bounds = array<i64: 1, 384>}, {pipeline_mode = #tpu.pipeline_mode<synchronous>, transform_indices = @transform_5, window_bounds = array<i64: 1, 384>}, {pipeline_mode = #tpu.pipeline_mode<synchronous>, transform_indices = @transform_6, window_bounds = array<i64: 1, 1>}, {transform_indices = @transform_7, window_bounds = array<i64: 8, 1>}]} {
    %c0 = arith.constant 0 : index
    %c0_0 = arith.constant 0 : index
    %0 = vector.load %arg1[%c0, %c0_0] : memref<8x20xf32, #tpu.memory_space<vmem>>, vector<8x20xf32>
    %1 = arith.truncf %0 : vector<8x20xf32> to vector<8x20xbf16>
    %c0_1 = arith.constant 0 : index
    %c0_2 = arith.constant 0 : index
    %2 = vector.load %arg2[%c0_1, %c0_2] : memref<20x512xbf16, #tpu.memory_space<vmem>>, vector<20x512xbf16>
    %cst = arith.constant dense<0.000000e+00> : vector<8x512xf32>
    %3 = tpu.matmul %1, %2, %cst {dimension_numbers = #tpu.dot_dimension_numbers<[1], [0], [0], [1], [0, 0, 1, 1], [], []>} : vector<8x20xbf16>, vector<20x512xbf16>, vector<8x512xf32> -> vector<8x512xf32>
    %c0_3 = arith.constant 0 : index
    %c0_4 = arith.constant 0 : index
    %4 = vector.load %arg3[%c0_3, %c0_4] : memref<1x512xf32, #tpu.memory_space<vmem>>, vector<1x512xf32>
    %5 = vector.broadcast %4 : vector<1x512xf32> to vector<8x512xf32>
    %6 = arith.addf %3, %5 : vector<8x512xf32>
    %7 = tpu.iota {dimensions = array<i32: 1>} : vector<8x512xi32>
    %c400_i32 = arith.constant 400 : i32
    %8 = vector.broadcast %c400_i32 : i32 to vector<8x512xi32>
    %9 = arith.cmpi slt, %7, %8 : vector<8x512xi32>
    %cst_5 = arith.constant 0.000000e+00 : f32
    %10 = vector.broadcast %cst_5 : f32 to vector<8x512xf32>
    %11 = arith.maximumf %6, %10 : vector<8x512xf32>
    %12 = arith.select %9, %11, %6 : vector<8x512xi1>, vector<8x512xf32>
    %13 = arith.truncf %12 : vector<8x512xf32> to vector<8x512xbf16>
    %c0_6 = arith.constant 0 : index
    %c0_7 = arith.constant 0 : index
    %14 = vector.load %arg4[%c0_6, %c0_7] : memref<512x384xbf16, #tpu.memory_space<vmem>>, vector<512x384xbf16>
    %cst_8 = arith.constant dense<0.000000e+00> : vector<8x384xf32>
    %15 = tpu.matmul %13, %14, %cst_8 {dimension_numbers = #tpu.dot_dimension_numbers<[1], [0], [0], [1], [0, 0, 1, 1], [], []>} : vector<8x512xbf16>, vector<512x384xbf16>, vector<8x384xf32> -> vector<8x384xf32>
    %c0_9 = arith.constant 0 : index
    %c0_10 = arith.constant 0 : index
    %16 = vector.load %arg5[%c0_9, %c0_10] : memref<1x384xf32, #tpu.memory_space<vmem>>, vector<1x384xf32>
    %17 = vector.broadcast %16 : vector<1x384xf32> to vector<8x384xf32>
    %18 = arith.addf %15, %17 : vector<8x384xf32>
    %cst_11 = arith.constant 0.000000e+00 : f32
    %19 = vector.broadcast %cst_11 : f32 to vector<8x384xf32>
    %20 = arith.maximumf %18, %19 : vector<8x384xf32>
    %c0_12 = arith.constant 0 : index
    %c0_13 = arith.constant 0 : index
    %21 = vector.load %arg6[%c0_12, %c0_13] : memref<1x384xf32, #tpu.memory_space<vmem>>, vector<1x384xf32>
    %22 = vector.broadcast %21 : vector<1x384xf32> to vector<8x384xf32>
    %23 = arith.mulf %20, %22 : vector<8x384xf32>
    %cst_14 = arith.constant dense<0.000000e+00> : vector<8xf32>
    %24 = vector.multi_reduction <add>, %23, %cst_14 [1] : vector<8x384xf32> to vector<8xf32>
    %25 = vector.shape_cast %24 : vector<8xf32> to vector<8x1xf32>
    %c0_15 = arith.constant 0 : index
    %c0_16 = arith.constant 0 : index
    %26 = vector.load %arg7[%c0_15, %c0_16] : memref<1x1xf32, #tpu.memory_space<vmem>>, vector<1x1xf32>
    %27 = vector.broadcast %26 : vector<1x1xf32> to vector<8x1xf32>
    %28 = arith.addf %25, %27 : vector<8x1xf32>
    %c0_17 = arith.constant 0 : index
    %c0_18 = arith.constant 0 : index
    %29 = vector.load %arg8[%c0_17, %c0_18] : memref<8x1xf32, #tpu.memory_space<vmem>>, vector<8x1xf32>
    tpu.vector_store %arg8[%c0_17, %c0_18], %28 {strides = array<i32>} : memref<8x1xf32, #tpu.memory_space<vmem>>, vector<8x1xf32>,
    return
  }
  func.func @transform_0(%arg0: i32) -> (i32, i32) {
    %c0_i32 = arith.constant 0 : i32
    %c0_i32_0 = arith.constant 0 : i32
    return %arg0, %c0_i32 : i32, i32
  }
  func.func @transform_1(%arg0: i32) -> (i32, i32) {
    %c0_i32 = arith.constant 0 : i32
    %c0_i32_0 = arith.constant 0 : i32
    %c0_i32_1 = arith.constant 0 : i32
    return %c0_i32, %c0_i32_0 : i32, i32
  }
  func.func @transform_2(%arg0: i32) -> (i32, i32) {
    %c0_i32 = arith.constant 0 : i32
    %c0_i32_0 = arith.constant 0 : i32
    %c0_i32_1 = arith.constant 0 : i32
    return %c0_i32, %c0_i32_0 : i32, i32
  }
  func.func @transform_3(%arg0: i32) -> (i32, i32) {
    %c0_i32 = arith.constant 0 : i32
    %c0_i32_0 = arith.constant 0 : i32
    %c0_i32_1 = arith.constant 0 : i32
    return %c0_i32, %c0_i32_0 : i32, i32
  }
  func.func @transform_4(%arg0: i32) -> (i32, i32) {
    %c0_i32 = arith.constant 0 : i32
    %c0_i32_0 = arith.constant 0 : i32
    %c0_i32_1 = arith.constant 0 : i32
    return %c0_i32, %c0_i32_0 : i32, i32
  }
  func.func @transform_5(%arg0: i32) -> (i32, i32) {
    %c0_i32 = arith.constant 0 : i32
    %c0_i32_0 = arith.constant 0 : i32
    %c0_i32_1 = arith.constant 0 : i32
    return %c0_i32, %c0_i32_0 : i32, i32
  }
  func.func @transform_6(%arg0: i32) -> (i32, i32) {
    %c0_i32 = arith.constant 0 : i32
    %c0_i32_0 = arith.constant 0 : i32
    %c0_i32_1 = arith.constant 0 : i32
    return %c0_i32, %c0_i32_0 : i32, i32
  }
  func.func @transform_7(%arg0: i32) -> (i32, i32) {
    %c0_i32 = arith.constant 0 : i32
    %c0_i32_0 = arith.constant 0 : i32
    return %arg0, %c0_i32 : i32, i32
  }
}

</mosaic_0001>

<bundles_post_ra>
// kernel: tpu_custom_call.1
= control target key start
LH: loop header
LB: loop body
LE: loop exit
PB: predicated region body
PF: predicated region fallthrough
CT: control target
= control target key end

     0   :  { %s1611_s0 = inlined_call_operand.hbm [shape: f32[8,20], index: 0, kind: input, shape index: {}]   ;;  %s1612_s1 = inlined_call_operand.hbm [shape: bf16[20,512], index: 1, kind: input, shape index: {}]   ;;  %s1613_s2 = inlined_call_operand.vmem [shape: f32[1,512], index: 2, kind: input, shape index: {}]   ;;  %s1614_s3 = inlined_call_operand.hbm [shape: bf16[512,384], index: 3, kind: input, shape index: {}]   ;;  %s1615_s4 = inlined_call_operand.vmem [shape: f32[1,384], index: 4, kind: input, shape index: {}]   ;;  %s1616_s5 = inlined_call_operand.vmem [shape: f32[1,384], index: 5, kind: input, shape index: {}]   ;;  %s1617_s6 = inlined_call_operand.<no memory space> [shape: f32[1,1], index: 6, kind: input, shape index: {}]   ;;  %s1618_s7 = inlined_call_operand.vmem [shape: f32[8,1], index: 7, kind: output, shape index: {}]  }
   0x1   :  { %v12_v0 = vstv %s1617_s6 }
   0x2   :  { %13 = vst [vmem:[#allocation2] sm:$0x1] %v12_v0 }
   0x3   :  { %14 = vsyncpa [#allocation4], 0 }
   0x4   :  { %15 = vsyncpa [#allocation6], 0  ;;  %s1485_s26 = smov [#allocation5]   ;;  %s1415_s30 = scalar_lea.hbm %s1612_s1, 768 }
   0x5   :  { %s31_s27 = sshll.u32 %s1485_s26, 4  ;;  %p1416_p0 = scmp.ne.s32.totalorder %s1612_s1, %s1415_s30  ;;  %s32_s27 = int_to_ptr.vmem [resolvable:$true] %s31_s27 }
   0x6   :  { %p1419_p1 = scmp.lt.u32.totalorder %s1415_s30, %s1612_s1 }
   0x8   :  { %p1421_p2 = pnand %p1419_p1, %p1416_p0 }
   0xa   :  { %1424 = shalt.err (!%p1421_p2)
}
   0xb   :  { %s1425_s6 = scalar_lea.vmem %s32_s27, 768  ;;  %p1430_p4 = scmp.lt.s32.totalorder %s32_s27, %s32_s27 }
   0xc   :  { %p1426_p3 = scmp.ne.s32.totalorder %s32_s27, %s1425_s6  ;;  %p1431_p5 = scmp.lt.s32.totalorder %s1425_s6, %s1425_s6 }
   0xe   :  { %p1432_p6 = por %p1431_p5, %p1430_p4 }
  0x10   :  { %p1433_p7 = pnand %p1432_p6, %p1426_p3 }
  0x12   :  { %1436 = shalt.err (!%p1433_p7)
}
  0x13   :  { %s1486_s12 = smov 256   ;;  %s1487_s13 = smov 16  }
  0x14   :  { %37 = dma.hbm_to_vmem [thread:$0]  %s1612_s1, 768, %s32_s27, [#allocation6], %s1486_s12, %s1486_s12, %s1487_s13  }
  0x15   :  { %s1488_s16 = smov [#allocation3]   ;;  %s1489_s18 = smov [#allocation7]  }
  0x16   :  { %s22_s17 = sshll.u32 %s1488_s16, 4  ;;  %s45_s19 = sshll.u32 %s1489_s18, 4  ;;  %s23_s17 = int_to_ptr.vmem [resolvable:$true] %s22_s17  ;;  %s46_s19 = int_to_ptr.vmem [resolvable:$true] %s45_s19 }
  0x17   :  { %s1437_s22 = scalar_lea.hbm %s1611_s0, 128 }
  0x18   :  { %p1438_p8 = scmp.ne.s32.totalorder %s1611_s0, %s1437_s22  ;;  %p1441_p9 = scmp.lt.u32.totalorder %s1437_s22, %s1611_s0 }
  0x1a   :  { %p1443_p10 = pnand %p1441_p9, %p1438_p8 }
  0x1c   :  { %1446 = shalt.err (!%p1443_p10)
}
  0x1d   :  { %s1447_s1 = scalar_lea.vmem %s23_s17, 128  ;;  %p1452_p12 = scmp.lt.s32.totalorder %s23_s17, %s23_s17 }
  0x1e   :  { %p1448_p11 = scmp.ne.s32.totalorder %s23_s17, %s1447_s1  ;;  %p1453_p13 = scmp.lt.s32.totalorder %s1447_s1, %s1447_s1 }
  0x20   :  { %p1454_p0 = por %p1453_p13, %p1452_p12 }
  0x22   :  { %p1455_p1 = pnand %p1454_p0, %p1448_p11 }
  0x24   :  { %1458 = shalt.err (!%p1455_p1)
}
  0x25   :  { %25 = dma.hbm_to_vmem [thread:$0]  %s1611_s0, 128, %s23_s17, [#allocation4]  }
  0x26   :  { %s1459_s8 = scalar_lea.hbm %s1614_s3, 12288 }
  0x27   :  { %p1460_p2 = scmp.ne.s32.totalorder %s1614_s3, %s1459_s8  ;;  %p1463_p3 = scmp.lt.u32.totalorder %s1459_s8, %s1614_s3 }
  0x29   :  { %p1465_p4 = pnand %p1463_p3, %p1460_p2 }
  0x2b   :  { %1468 = shalt.err (!%p1465_p4)
}
  0x2c   :  { %s1469_s12 = scalar_lea.vmem %s46_s19, 12288  ;;  %p1474_p6 = scmp.lt.s32.totalorder %s46_s19, %s46_s19 }
  0x2d   :  { %p1470_p5 = scmp.ne.s32.totalorder %s46_s19, %s1469_s12  ;;  %p1475_p7 = scmp.lt.s32.totalorder %s1469_s12, %s1469_s12 }
  0x2f   :  { %p1476_p8 = por %p1475_p7, %p1474_p6 }
  0x31   :  { %p1477_p9 = pnand %p1476_p8, %p1470_p5 }
  0x33   :  { %1480 = shalt.err (!%p1477_p9)
}
  0x34   :  { %s1490_s0 = smov 192   ;;  %s1491_s13 = smov 12  }
  0x35   :  { %51 = dma.hbm_to_vmem [thread:$0]  %s1614_s3, 12288, %s46_s19, [#allocation6], %s1490_s0, %s1490_s0, %s1491_s13  }
  0x36   :  { %1481 = dma.done.wait [#allocation4], 128  }
  0x37   :  { %1482 = vsyncadd [#allocation4], 4294967168 }
  0x38   :  { %1483 = dma.done.wait [#allocation6], 13056  }
  0x39   :  { %1484 = vsyncadd [#allocation6], 4294954240  ;;  %v1492_v1 = vmov 0   ;;  %v1277_v2 = vld [vmem:[#allocation5 + $0x4] ss:$16 sps:$4 sm:$0xff]   ;;  %vm132_vm0 = vcmask 1041408  }
  0x3a   :  { %177 = vmatprep.mubr.bf16.mxu1 %v1492_v1  ;;  %v1279_v3 = vld [vmem:[#allocation5] ss:$16 sps:$4 sm:$0xff]   ;;  %145 = vmatprep.subr.bf16.mxu1 %v1277_v2  ;;  %v68_v7 = vld [vmem:[#allocation3] sm:$0xff]  ;;  %v75_v9 = vld [vmem:[#allocation5 + $0x28] sm:$0x33]  ;;  %vm128_vm1 = vcmask 162816   ;;  %v78_v2 = vlaneseq }
  0x3b   :  { %v74_v4 = vld [vmem:[#allocation5 + $0x20] sm:$0x33]  ;;  %146 = vmatpush1.bf16.msra.mxu1 %v1279_v3  ;;  %v1284_v8 = vld [vmem:[#allocation5 + $0xc] ss:$16 sps:$4 sm:$0xff]   ;;  %v69_v14 = vpack.c.bf16 %v68_v7, %v68_v7  ;;  %v1282_v15 = vld [vmem:[#allocation5 + $0x8] ss:$16 sps:$4 sm:$0xff]   ;;  %v1117_v16 = vcombine.high %v75_v9, %v75_v9  ;;  %v1116_v17 = vcombine.low %v75_v9, %v75_v9 }
  0x3c   :  { %v1115_v5 = vcombine.high %v74_v4, %v74_v4  ;;  %v1114_v6 = vcombine.low %v74_v4, %v74_v4  ;;  %v1287_v11 = vld [vmem:[#allocation7 + $0x4] ss:$12 sps:$4 sm:$0xff]   ;;  %v1289_v12 = vld [vmem:[#allocation7] ss:$12 sps:$4 sm:$0xff]   ;;  %v1290_v13 = vld [vmem:[#allocation7 + $0x1c] ss:$12 sps:$4 sm:$0xff]  }
  0x3d   :  { %905 = vmatprep.subr.bf16.mxu0 %v1287_v11  ;;  %v1292_v18 = vld [vmem:[#allocation7 + $0x18] ss:$12 sps:$4 sm:$0xff]   ;;  %v1293_v19 = vld [vmem:[#allocation7 + $0x34] ss:$12 sps:$4 sm:$0xff]   ;;  %v140_v20 = vsel %vm132_vm0, %v1116_v17, 0  ;;  %v79_v3 = vshrl.u32 %v78_v2, 7 }
  0x3e   :  { %1118 = vmatprep.subr.msk.bf16.mxu1 %vm132_vm0, %v1115_v5  ;;  %v134_v10 = vsel %vm132_vm0, %v1114_v6, 0  ;;  %906 = vmatpush1.bf16.msra.mxu0 %v1289_v12  ;;  %v1295_v21 = vld [vmem:[#allocation7 + $0x30] ss:$12 sps:$4 sm:$0xff]   ;;  %v1296_v22 = vld [vmem:[#allocation7 + $0x4c] ss:$12 sps:$4 sm:$0xff]   ;;  %v228_v17 = vand.u32 127, %v78_v2 }
  0x3f   :  { %148 = vmatpush1.bf16.msra.mxu1 %v134_v10  ;;  %907 = vmatprep.subr.bf16.mxu0 %v1290_v13  ;;  %v1298_v23 = vld [vmem:[#allocation7 + $0x48] ss:$12 sps:$4 sm:$0xff]   ;;  %v1299_v24 = vld [vmem:[#allocation7 + $0x64] ss:$12 sps:$4 sm:$0xff]   ;;  %v1301_v27 = vld [vmem:[#allocation7 + $0x60] ss:$12 sps:$4 sm:$0xff]  }
  0x40   :  { %186 = vmatprep.subr.bf16.mxu1 %v1284_v8  ;;  %v1313_v25 = vld [vmem:[#allocation7 + $0xc8] ss:$12 sps:$4 sm:$0xff]   ;;  %v1318_v28 = vld [vmem:[#allocation7 + $0xe0] ss:$12 sps:$4 sm:$0xff]   ;;  %v1323_v31 = vld [vmem:[#allocation7 + $0xf8] ss:$12 sps:$4 sm:$0xff]  }
  0x41   :  { %v1315_v26 = vld [vmem:[#allocation7 + $0x8] ss:$12 sps:$4 sm:$0xff]   ;;  %v1320_v29 = vld [vmem:[#allocation7 + $0x20] ss:$12 sps:$4 sm:$0xff]   ;;  %v1304_v32 = vld [vmem:[#allocation7 + $0x78] ss:$12 sps:$4 sm:$0xff]  }
  0x42   :  { %1119 = vmatmul.mubr.msk.bf16.vlgmr.msra.gmra.mrb[0].mxu1 %vm128_vm1, %v69_v14  ;;  %908 = vmatpush1.bf16.msra.mxu0 %v1292_v18  ;;  %v1302_v30 = vld [vmem:[#allocation7 + $0x7c] ss:$12 sps:$4 sm:$0xff]   ;;  %v1325_v33 = vld [vmem:[#allocation7 + $0x38] ss:$12 sps:$4 sm:$0xff]   ;;  %v1305_v34 = vld [vmem:[#allocation7 + $0x94] ss:$12 sps:$4 sm:$0xff]  }
  0x43   :  { %187 = vmatpush1.bf16.msra.mxu1 %v1282_v15  ;;  %218 = vmatprep.mubr.bf16.mxu1 %v1492_v1  ;;  %v1328_v35 = vld [vmem:[#allocation7 + $0x110] ss:$12 sps:$4 sm:$0xff]   ;;  %v1308_v38 = vld [vmem:[#allocation7 + $0xac] ss:$12 sps:$4 sm:$0xff]   ;;  %v1333_v39 = vld [vmem:[#allocation7 + $0x128] ss:$12 sps:$4 sm:$0xff]  }
  0x44   :  { %1120 = vmatprep.subr.msk.bf16.mxu1 %vm132_vm0, %v1117_v16  ;;  %909 = vmatprep.subr.bf16.mxu0 %v1293_v19  ;;  %v1330_v36 = vld [vmem:[#allocation7 + $0x50] ss:$12 sps:$4 sm:$0xff]   ;;  %v1310_v40 = vld [vmem:[#allocation7 + $0xa8] ss:$12 sps:$4 sm:$0xff]   ;;  %v1338_v42 = vld [vmem:[#allocation7 + $0x140] ss:$12 sps:$4 sm:$0xff]  }
  0x45   :  { %v1307_v37 = vld [vmem:[#allocation7 + $0x90] ss:$12 sps:$4 sm:$0xff]   ;;  %v1335_v41 = vld [vmem:[#allocation7 + $0x68] ss:$12 sps:$4 sm:$0xff]   ;;  %v1314_v44 = vld [vmem:[#allocation7 + $0xc0] ss:$12 sps:$4 sm:$0xff]  }
  0x46   :  { %910 = vmatpush1.bf16.msra.mxu0 %v1295_v21  ;;  %v1311_v43 = vld [vmem:[#allocation7 + $0xc4] ss:$12 sps:$4 sm:$0xff]   ;;  %v1340_v45 = vld [vmem:[#allocation7 + $0x80] ss:$12 sps:$4 sm:$0xff]   ;;  %v1316_v46 = vld [vmem:[#allocation7 + $0xdc] ss:$12 sps:$4 sm:$0xff]  }
  0x47   :  { %189 = vmatpush1.bf16.msra.mxu1 %v140_v20  ;;  %911 = vmatprep.subr.bf16.mxu0 %v1296_v22  ;;  %v1319_v47 = vld [vmem:[#allocation7 + $0xd8] ss:$12 sps:$4 sm:$0xff]   ;;  %v1321_v48 = vld [vmem:[#allocation7 + $0xf4] ss:$12 sps:$4 sm:$0xff]   ;;  %v1324_v49 = vld [vmem:[#allocation7 + $0xf0] ss:$12 sps:$4 sm:$0xff]  }
  0x48   :  { %1219 = vmatprep.subr.bf16.mxu1 %v1313_v25  ;;  %v1326_v50 = vld [vmem:[#allocation7 + $0x10c] ss:$12 sps:$4 sm:$0xff]   ;;  %v1329_v51 = vld [vmem:[#allocation7 + $0x108] ss:$12 sps:$4 sm:$0xff]   ;;  %v1331_v52 = vld [vmem:[#allocation7 + $0x124] ss:$12 sps:$4 sm:$0xff]  }
  0x49   :  { %v1334_v53 = vld [vmem:[#allocation7 + $0x120] ss:$12 sps:$4 sm:$0xff]   ;;  %v1336_v54 = vld [vmem:[#allocation7 + $0x13c] ss:$12 sps:$4 sm:$0xff]   ;;  %v1339_v55 = vld [vmem:[#allocation7 + $0x138] ss:$12 sps:$4 sm:$0xff]  }
  0x4a   :  { %1121 = vmatmul.mubr.msk.bf16.vlgmr.msra.gmra.mrb[4].mxu1 %vm128_vm1, %v69_v14  ;;  %912 = vmatpush1.bf16.msra.mxu0 %v1298_v23  ;;  %v1341_v56 = vld [vmem:[#allocation7 + $0x154] ss:$12 sps:$4 sm:$0xff]   ;;  %v1343_v57 = vld [vmem:[#allocation7 + $0x158] ss:$12 sps:$4 sm:$0xff]   ;;  %v1344_v58 = vld [vmem:[#allocation7 + $0x150] ss:$12 sps:$4 sm:$0xff]  }
  0x4b   :  { %1220 = vmatpush3.bf16.msra.mxu1 %v1315_v26  ;;  %913 = vmatprep.subr.bf16.mxu0 %v1299_v24  ;;  %v1345_v59 = vld [vmem:[#allocation7 + $0x98] ss:$12 sps:$4 sm:$0xff]   ;;  %v1348_v61 = vld [vmem:[#allocation7 + $0x170] ss:$12 sps:$4 sm:$0xff]   ;;  %v1349_v62 = vld [vmem:[#allocation7 + $0x168] ss:$12 sps:$4 sm:$0xff]  }
  0x4c   :  { %1221 = vmatprep.subr.bf16.mxu1 %v1318_v28  ;;  %v1346_v60 = vld [vmem:[#allocation7 + $0x16c] ss:$12 sps:$4 sm:$0xff]   ;;  %v1350_v63 = vld [vmem:[#allocation7 + $0xb0] ss:$12 sps:$4 sm:$0xff]   ;;  %v1354_v1 = vld [vmem:[#allocation7 + $0x248] ss:$12 sps:$4 sm:$0xff]  }
  0x4d   :  { %v1353_v0 = vld [vmem:[#allocation7 + $0x184] ss:$12 sps:$4 sm:$0xff]   ;;  %v1578_v4 = vsub.s32 0, %v79_v3  ;;  %v1585_v6 = vsub.s32 1, %v79_v3  ;;  %v92_v14 = vsub.s32 3, %v79_v3  ;;  %v231_v26 = vadd.s32 384, %v228_v17 }
  0x4e   :  { %914 = vmatpush1.bf16.msra.mxu0 %v1301_v27  ;;  %v1583_v5 = vld [vmem:[%s1613_s2] sm:$0xf]  ;;  %v1351_v20 = vld [vmem:[#allocation7 + $0x180] ss:$12 sps:$4 sm:$0xff]   ;;  %v1409_v17 = vld [vmem:[#allocation7 + $0x2d0] ss:$12 sps:$4 sm:$0xff]  }
  0x4f   :  { %1222 = vmatpush3.bf16.msra.mxu1 %v1320_v29  ;;  %915 = vmatprep.subr.bf16.mxu0 %v1302_v30  ;;  %v81_v7 = vrot.slane %v1583_v5, %v1578_v4  ;;  %v85_v8 = vrot.slane %v1583_v5, %v1585_v6  ;;  %v1355_v21 = vld [vmem:[#allocation7 + $0x188] ss:$12 sps:$4 sm:$0xff]   ;;  %v93_v22 = vrot.slane %v1583_v5, %v92_v14  ;;  %v1359_v25 = vld [vmem:[#allocation7 + $0x260] ss:$12 sps:$4 sm:$0xff]   ;;  %v1356_v29 = vld [vmem:[#allocation7 + $0x198] ss:$12 sps:$4 sm:$0xff]  }
  0x50   :  { %1223 = vmatprep.subr.bf16.mxu1 %v1323_v31  ;;  %v1358_v24 = vld [vmem:[#allocation7 + $0x19c] ss:$12 sps:$4 sm:$0xff]   ;;  %v1360_v30 = vld [vmem:[#allocation7 + $0x1a0] ss:$12 sps:$4 sm:$0xff]   ;;  %vm235_vm2 = vcmp.lt.s32.totalorder %v231_v26, 400  ;;  %vm1102_vm3 = vcmask 7168  }
  0x51   :  { %v1408_v14 = vld [vmem:[#allocation7 + $0x2bc] ss:$12 sps:$4 sm:$0xff]  }
  0x52   :  { %916 = vmatpush1.bf16.msra.mxu0 %v1304_v32 }
  0x53   :  { %1224 = vmatpush3.bf16.msra.mxu1 %v1325_v33  ;;  %917 = vmatprep.subr.bf16.mxu0 %v1305_v34  ;;  %v1363_v33 = vld [vmem:[#allocation7 + $0x1b4] ss:$12 sps:$4 sm:$0xff]   ;;  %v1364_v34 = vld [vmem:[#allocation7 + $0x278] ss:$12 sps:$4 sm:$0xff]  }
  0x54   :  { %1225 = vmatprep.subr.bf16.mxu1 %v1328_v35 }
  0x56   :  { %918 = vmatpush1.bf16.msra.mxu0 %v1307_v37  ;;  %v1361_v37 = vld [vmem:[#allocation7 + $0x1b0] ss:$12 sps:$4 sm:$0xff]  }
  0x57   :  { %1226 = vmatpush3.bf16.msra.mxu1 %v1330_v36  ;;  %919 = vmatprep.subr.bf16.mxu0 %v1308_v38  ;;  %v1365_v38 = vld [vmem:[#allocation7 + $0x1b8] ss:$12 sps:$4 sm:$0xff]  }
  0x58   :  { %1227 = vmatprep.subr.bf16.mxu1 %v1333_v39 }
  0x5a   :  { %920 = vmatpush1.bf16.msra.mxu0 %v1310_v40  ;;  %v1368_v40 = vld [vmem:[#allocation7 + $0x1cc] ss:$12 sps:$4 sm:$0xff]  }
  0x5b   :  { %1228 = vmatpush3.bf16.msra.mxu1 %v1335_v41  ;;  %921 = vmatprep.subr.bf16.mxu0 %v1311_v43  ;;  %v1369_v41 = vld [vmem:[#allocation7 + $0x290] ss:$12 sps:$4 sm:$0xff]   ;;  %v1366_v43 = vld [vmem:[#allocation7 + $0x1c8] ss:$12 sps:$4 sm:$0xff]  }
  0x5c   :  { %1229 = vmatprep.subr.bf16.mxu1 %v1338_v42 }
  0x5e   :  { %922 = vmatpush1.bf16.msra.mxu0 %v1314_v44  ;;  %v1370_v44 = vld [vmem:[#allocation7 + $0x1d0] ss:$12 sps:$4 sm:$0xff]  }
  0x5f   :  { %1230 = vmatpush3.bf16.msra.mxu1 %v1340_v45  ;;  %923 = vmatprep.subr.bf16.mxu0 %v1316_v46  ;;  %v1373_v45 = vld [vmem:[#allocation7 + $0x1e4] ss:$12 sps:$4 sm:$0xff]   ;;  %v1374_v46 = vld [vmem:[#allocation7 + $0x2a8] ss:$12 sps:$4 sm:$0xff]  }
  0x60   :  { %1231 = vmatprep.subr.bf16.mxu1 %v1343_v57 }
  0x62   :  { %924 = vmatpush1.bf16.msra.mxu0 %v1319_v47  ;;  %v1592_v47 = vsub.s32 2, %v79_v3  ;;  %v1391_v3 = vld [vmem:[#allocation7 + $0x240] ss:$12 sps:$4 sm:$0xff]  }
  0x63   :  { %925 = vmatprep.subr.bf16.mxu0 %v1321_v48  ;;  %1232 = vmatpush3.bf16.msra.mxu1 %v1345_v59  ;;  %v1371_v48 = vld [vmem:[#allocation7 + $0x1e0] ss:$12 sps:$4 sm:$0xff]   ;;  %v1385_v59 = vld [vmem:[#allocation7 + $0x218] ss:$12 sps:$4 sm:$0xff]  }
  0x64   :  { %1233 = vmatprep.subr.bf16.mxu1 %v1348_v61  ;;  %v1389_v61 = vld [vmem:[#allocation7 + $0x2f0] ss:$12 sps:$4 sm:$0xff]  }
  0x66   :  { %926 = vmatpush1.bf16.msra.mxu0 %v1324_v49  ;;  %v1375_v49 = vld [vmem:[#allocation7 + $0x1e8] ss:$12 sps:$4 sm:$0xff]  }
  0x67   :  { %927 = vmatprep.subr.bf16.mxu0 %v1326_v50  ;;  %1234 = vmatpush3.bf16.msra.mxu1 %v1350_v63  ;;  %v1378_v50 = vld [vmem:[#allocation7 + $0x1fc] ss:$12 sps:$4 sm:$0xff]  }
  0x68   :  { %1241 = vmatprep.subr.bf16.mxu1 %v1354_v1  ;;  %v1386_v63 = vld [vmem:[#allocation7 + $0x228] ss:$12 sps:$4 sm:$0xff]   ;;  %v1393_v1 = vld [vmem:[#allocation7 + $0x244] ss:$12 sps:$4 sm:$0xff]  }
  0x6a   :  { %928 = vmatpush1.bf16.msra.mxu0 %v1329_v51  ;;  %v1379_v51 = vld [vmem:[#allocation7 + $0x2c0] ss:$12 sps:$4 sm:$0xff]  }
  0x6b   :  { %929 = vmatprep.subr.bf16.mxu0 %v1331_v52  ;;  %v89_v52 = vrot.slane %v1583_v5, %v1592_v47  ;;  %v1396_v5 = vld [vmem:[#allocation7 + $0x25c] ss:$12 sps:$4 sm:$0xff]  }
  0x6e   :  { %930 = vmatpush1.bf16.msra.mxu0 %v1334_v53  ;;  %v1376_v53 = vld [vmem:[#allocation7 + $0x1f8] ss:$12 sps:$4 sm:$0xff]  }
  0x6f   :  { %931 = vmatprep.subr.bf16.mxu0 %v1336_v54  ;;  %v1380_v54 = vld [vmem:[#allocation7 + $0x200] ss:$12 sps:$4 sm:$0xff]  }
  0x72   :  { %932 = vmatpush1.bf16.msra.mxu0 %v1339_v55  ;;  %v1383_v55 = vld [vmem:[#allocation7 + $0x214] ss:$12 sps:$4 sm:$0xff]  }
  0x73   :  { %933 = vmatprep.subr.bf16.mxu0 %v1341_v56  ;;  %v1384_v56 = vld [vmem:[#allocation7 + $0x2d8] ss:$12 sps:$4 sm:$0xff]  }
  0x76   :  { %934 = vmatpush1.bf16.msra.mxu0 %v1344_v58  ;;  %v1381_v58 = vld [vmem:[#allocation7 + $0x210] ss:$12 sps:$4 sm:$0xff]  }
  0x77   :  { %935 = vmatprep.subr.bf16.mxu0 %v1346_v60  ;;  %v1388_v60 = vld [vmem:[#allocation7 + $0x22c] ss:$12 sps:$4 sm:$0xff]  }
  0x7a   :  { %936 = vmatpush1.bf16.msra.mxu0 %v1349_v62 }
  0x7b   :  { %946 = vmatprep.subr.bf16.mxu0 %v1353_v0  ;;  %v1390_v0 = vld [vmem:[#allocation7 + $0x230] ss:$12 sps:$4 sm:$0xff]  }
 0x115   :  { %v179_v9 = vpop.f32.mrb[0].mxu1 }
 0x116   :  { %v180_v10 = vadd.f32 %v179_v9, %v81_v7  ;;  %v181_v11 = vpop.f32.mrb[1].mxu1  ;;  %v1394_v7 = vld [vmem:[#allocation7 + $0x258] ss:$12 sps:$4 sm:$0xff]   ;;  %v1397_v9 = vld [vmem:[#allocation7 + $0x270] ss:$12 sps:$4 sm:$0xff]  }
 0x117   :  { %v182_v12 = vadd.f32 %v181_v11, %v85_v8  ;;  %v183_v13 = vpop.f32.mrb[2].mxu1  ;;  %v1399_v8 = vld [vmem:[#allocation7 + $0x274] ss:$12 sps:$4 sm:$0xff]  }
 0x118   :  { %v236_v15 = vmax.f32 %v180_v10, 0.0  ;;  %v184_v16 = vpop.f32.mrb[3].mxu1  ;;  %v1402_v10 = vld [vmem:[#allocation7 + $0x28c] ss:$12 sps:$4 sm:$0xff]   ;;  %v1400_v11 = vld [vmem:[#allocation7 + $0x288] ss:$12 sps:$4 sm:$0xff]  }
 0x119   :  { %v237_v18 = vmax.f32 %v182_v12, 0.0  ;;  %v1405_v12 = vld [vmem:[#allocation7 + $0x2a4] ss:$12 sps:$4 sm:$0xff]   ;;  %v1403_v13 = vld [vmem:[#allocation7 + $0x2a0] ss:$12 sps:$4 sm:$0xff]  }
 0x11a   :  { %v244_v23 = vpack.c.bf16 %v236_v15, %v236_v15  ;;  %v1406_v15 = vld [vmem:[#allocation7 + $0x2b8] ss:$12 sps:$4 sm:$0xff]   ;;  %v1411_v16 = vld [vmem:[#allocation7 + $0x2d4] ss:$12 sps:$4 sm:$0xff]  }
 0x11b   :  { %v245_v19 = vpack.c.bf16 %v237_v18, %v237_v18  ;;  %v1414_v18 = vld [vmem:[#allocation7 + $0x2ec] ss:$12 sps:$4 sm:$0xff]  }
 0x11d   :  { %937 = vmatprep.mubr.bf16.mxu0 %v245_v19  ;;  %1019 = vmatprep.mubr.bf16.mxu1 %v245_v19  ;;  %v220_v27 = vpop.f32.mrb[4].mxu1  ;;  %v1412_v19 = vld [vmem:[#allocation7 + $0x2e8] ss:$12 sps:$4 sm:$0xff]  }
 0x11e   :  { %938 = vmatmul.mubr.bf16.vlgmr.msra.gmra.mrb[0].mxu0 %v244_v23  ;;  %1020 = vmatmul.mubr.bf16.vlgmr.msra.gmra.mrb[8].mxu1 %v244_v23  ;;  %v222_v28 = vpop.f32.mrb[5].mxu1  ;;  %v221_v57 = vadd.f32 %v220_v27, %v89_v52 }
 0x11f   :  { %947 = vmatpush1.bf16.msra.mxu0 %v1351_v20  ;;  %1242 = vmatpush3.bf16.msra.mxu1 %v1355_v21  ;;  %v223_v31 = vadd.f32 %v222_v28, %v93_v22  ;;  %v224_v32 = vpop.f32.mrb[6].mxu1 }
 0x120   :  { %948 = vmatprep.subr.bf16.mxu0 %v1358_v24  ;;  %1243 = vmatprep.subr.bf16.mxu1 %v1359_v25  ;;  %v225_v35 = vpop.f32.mrb[7].mxu1  ;;  %v238_v62 = vmax.f32 %v221_v57, 0.0  ;;  %v376_v25 = vld [vmem:[%s1615_s4] sm:$0x7] }
 0x121   :  { %v239_v36 = vmax.f32 %v223_v31, 0.0  ;;  %v389_v26 = vrot.slane %v376_v25, %v1592_v47  ;;  %v385_v35 = vrot.slane %v376_v25, %v1585_v6 }
 0x122   :  { %v246_v2 = vpack.c.bf16 %v238_v62, %v238_v62 }
 0x123   :  { %949 = vmatpush1.bf16.msra.mxu0 %v1356_v29  ;;  %1244 = vmatpush3.bf16.msra.mxu1 %v1360_v30  ;;  %v243_v39 = vsel %vm235_vm2, %v239_v36, %v223_v31 }
 0x124   :  { %950 = vmatprep.subr.bf16.mxu0 %v1363_v33  ;;  %1245 = vmatprep.subr.bf16.mxu1 %v1364_v34  ;;  %v247_v42 = vpack.c.bf16 %v243_v39, %v243_v39  ;;  %v381_v34 = vrot.slane %v376_v25, %v1578_v4 }
 0x126   :  { %1059 = vmatprep.mubr.bf16.mxu1 %v247_v42  ;;  %978 = vmatprep.mubr.bf16.mxu0 %v247_v42 }
 0x127   :  { %951 = vmatpush1.bf16.msra.mxu0 %v1361_v37  ;;  %1246 = vmatpush3.bf16.msra.mxu1 %v1365_v38  ;;  %v1070_v37 = vld [vmem:[%s1616_s5] sm:$0x7] }
 0x128   :  { %952 = vmatprep.subr.bf16.mxu0 %v1368_v40  ;;  %1247 = vmatprep.subr.bf16.mxu1 %v1369_v41  ;;  %v1075_v39 = vrot.slane %v1070_v37, %v1578_v4  ;;  %v1079_v42 = vrot.slane %v1070_v37, %v1585_v6 }
 0x12b   :  { %953 = vmatpush1.bf16.msra.mxu0 %v1366_v43  ;;  %1248 = vmatpush3.bf16.msra.mxu1 %v1370_v44 }
 0x12c   :  { %954 = vmatprep.subr.bf16.mxu0 %v1373_v45  ;;  %1249 = vmatprep.subr.bf16.mxu1 %v1374_v46 }
 0x12f   :  { %955 = vmatpush1.bf16.msra.mxu0 %v1371_v48  ;;  %1250 = vmatpush3.bf16.msra.mxu1 %v1375_v49  ;;  %v1083_v49 = vrot.slane %v1070_v37, %v1592_v47 }
 0x130   :  { %956 = vmatprep.subr.bf16.mxu0 %v1378_v50  ;;  %1251 = vmatprep.subr.bf16.mxu1 %v1379_v51 }
 0x133   :  { %957 = vmatpush1.bf16.msra.mxu0 %v1376_v53  ;;  %1252 = vmatpush3.bf16.msra.mxu1 %v1380_v54 }
 0x134   :  { %958 = vmatprep.subr.bf16.mxu0 %v1383_v55  ;;  %1253 = vmatprep.subr.bf16.mxu1 %v1384_v56  ;;  %v1218_v55 = vld [vmem:[#allocation2] ss:$0 sm:$0xff] }
 0x137   :  { %959 = vmatpush1.bf16.msra.mxu0 %v1381_v58  ;;  %1254 = vmatpush3.bf16.msra.mxu1 %v1385_v59 }
 0x138   :  { %960 = vmatprep.subr.bf16.mxu0 %v1388_v60  ;;  %1255 = vmatprep.subr.bf16.mxu1 %v1389_v61 }
 0x13b   :  { %961 = vmatpush1.bf16.msra.mxu0 %v1386_v63  ;;  %1256 = vmatpush3.bf16.msra.mxu1 %v1390_v0 }
 0x13c   :  { %962 = vmatprep.subr.bf16.mxu0 %v1393_v1 }
 0x13e   :  { %1060 = vmatmul.mubr.bf16.vlgmr.msra.gmra.mrb[12].mxu1 %v246_v2 }
 0x13f   :  { %963 = vmatpush1.bf16.msra.mxu0 %v1391_v3 }
 0x140   :  { %964 = vmatprep.subr.bf16.mxu0 %v1396_v5 }
 0x143   :  { %965 = vmatpush1.bf16.msra.mxu0 %v1394_v7 }
 0x144   :  { %966 = vmatprep.subr.bf16.mxu0 %v1399_v8 }
 0x147   :  { %967 = vmatpush1.bf16.msra.mxu0 %v1397_v9 }
 0x148   :  { %968 = vmatprep.subr.bf16.mxu0 %v1402_v10 }
 0x14b   :  { %969 = vmatpush1.bf16.msra.mxu0 %v1400_v11 }
 0x14c   :  { %970 = vmatprep.subr.bf16.mxu0 %v1405_v12 }
 0x14f   :  { %971 = vmatpush1.bf16.msra.mxu0 %v1403_v13 }
 0x150   :  { %972 = vmatprep.subr.bf16.mxu0 %v1408_v14 }
 0x153   :  { %973 = vmatpush1.bf16.msra.mxu0 %v1406_v15 }
 0x154   :  { %974 = vmatprep.subr.bf16.mxu0 %v1411_v16 }
 0x157   :  { %975 = vmatpush1.bf16.msra.mxu0 %v1409_v17 }
 0x158   :  { %976 = vmatprep.subr.bf16.mxu0 %v1414_v18 }
 0x15b   :  { %977 = vmatpush1.bf16.msra.mxu0 %v1412_v19 }
 0x15e   :  { %979 = vmatmul.mubr.bf16.vlgmr.msra.gmra.mrb[0].mxu0 %v246_v2 }
 0x1f1   :  { %v1235_v20 = vpop.f32.mrb[8].mxu1 }
 0x1f2   :  { %v1236_v21 = vpop.f32.mrb[9].mxu1 }
 0x1f3   :  { %v1237_v22 = vadd.f32 %v1236_v21, %v1235_v20  ;;  %v1238_v23 = vpop.f32.mrb[10].mxu1 }
 0x1f4   :  { %v1239_v24 = vpop.f32.mrb[11].mxu1 }
 0x1f5   :  { %v1022_v29 = vadd.f32 %v1237_v22, %v389_v26 }
 0x211   :  { %v1257_v27 = vpop.f32.mrb[12].mxu1 }
 0x212   :  { %v1258_v28 = vpop.f32.mrb[13].mxu1 }
 0x213   :  { %v1259_v30 = vadd.f32 %v1258_v28, %v1257_v27  ;;  %v1260_v31 = vpop.f32.mrb[14].mxu1 }
 0x214   :  { %v1261_v32 = vpop.f32.mrb[15].mxu1 }
 0x215   :  { %v1062_v33 = vadd.f32 %v1259_v30, %v1022_v29 }
 0x217   :  { %v1069_v46 = vmax.f32 %v1062_v33, 0.0 }
 0x219   :  { %v1089_v52 = vmul.f32 %v1083_v49, %v1069_v46 }
 0x231   :  { %v980_v36 = vpop.f32.mrb[0].mxu0 }
 0x232   :  { %v1263_v38 = vadd.f32 %v980_v36, %v381_v34  ;;  %v982_v40 = vpop.f32.mrb[1].mxu0 }
 0x233   :  { %v1264_v41 = vadd.f32 %v982_v40, %v385_v35  ;;  %v984_v43 = vpop.f32.mrb[2].mxu0 }
 0x234   :  { %v1067_v44 = vmax.f32 %v1263_v38, 0.0  ;;  %v985_v45 = vpop.f32.mrb[3].mxu0 }
 0x235   :  { %v1068_v48 = vmax.f32 %v1264_v41, 0.0 }
 0x236   :  { %v1087_v50 = vmul.f32 %v1075_v39, %v1067_v44 }
 0x237   :  { %v1088_v51 = vmul.f32 %v1079_v42, %v1068_v48 }
 0x239   :  { %v1090_v53 = vadd.f32 %v1088_v51, %v1087_v50 }
 0x23b   :  { %v1091_v54 = vadd.f32 %v1090_v53, %v1089_v52 }
 0x23d   :  { %1092 = vadd.xlane.f32.xlu0 %v1091_v54 }
 0x2ca   :  { %v1093_v56 = vpop.xlane.xlu0 %1092 }
 0x2cb   :  { %v1101_v4 = vadd.f32 %v1218_v55, %v1093_v56 }
 0x2cd   :  { %1103 = vst.msk [vmem:[%s1618_s7] sm:$0xff] %vm1102_vm3, %v1101_v4 }
 0x2ce   :  { %1108 = vsyncpa [#allocation4], 1 }
 0x2cf   :  { %1109 = vsyncpa [#allocation6], 1 }

</bundles_post_ra>
